<compile_context>
chip_gen: v7x
topology: tpu7x:2x2x1
jax: 0.10.0
libtpu: 0.0.40
codegen_flags: <defaults>
</compile_context>

<pallas_src>
import jax
import jax.numpy as jnp
from jax.experimental import pallas as pl
from jax.experimental.pallas import tpu as pltpu


def _lstm_chunk_kernel(xg_ref, whh_ref, h0_ref, c0_ref, out_ref, h_sc, c_sc):
    """Process one (T_CHUNK, B_SHARD) slab of precomputed input-projection gates.

    xg_ref : (T_CHUNK, B_SHARD, 4H)  x_t @ W_ih^T + (b_ih + b_hh), precomputed
    whh_ref: (H, 4H)                 W_hh^T (recurrent weights)
    h0/c0  : (B_SHARD, H)            initial state
    out_ref: (T_CHUNK, B_SHARD, H)   hidden states for this chunk
    h_sc/c_sc: VMEM scratch carrying the state across time chunks.
    """
    chunk = pl.program_id(1)

    @pl.when(chunk == 0)
    def _():
        h_sc[...] = h0_ref[...]
        c_sc[...] = c0_ref[...]

    H = h_sc.shape[-1]
    t_chunk = xg_ref.shape[0]
    whh = whh_ref[...]                       # hoisted: loaded once per chunk

    def step(s, carry):
        h, c = carry
        # Recurrent projection: a single MXU push per time step.
        gates = xg_ref[s] + jnp.dot(h, whh, preferred_element_type=jnp.float32)
        # Activations on the full-width (B, 4H) vector (dense VPU/EUP work),
        # slice only for the cheap elementwise combine.  Gate order [i, f, g, o].
        sig = jax.nn.sigmoid(gates)
        tnh = jnp.tanh(gates)
        i_g = sig[:, 0 * H:1 * H]
        f_g = sig[:, 1 * H:2 * H]
        g_g = tnh[:, 2 * H:3 * H]
        o_g = sig[:, 3 * H:4 * H]
        c_new = f_g * c + i_g * g_g
        h_new = o_g * jnp.tanh(c_new)
        out_ref[s] = h_new                   # VMEM store; HBM writeback is one slab/chunk
        return h_new, c_new

    h, c = jax.lax.fori_loop(0, t_chunk, step, (h_sc[...], c_sc[...]),
                             unroll=True)
    h_sc[...] = h
    c_sc[...] = c


def lstm_pallas(x_gates, w_hh_t, h0, c0, *, t_chunk, b_shard=None):
    """x_gates: (T, Bp, 4H) time-major precomputed gates.  Returns (T, Bp, H)."""
    T, Bp, G = x_gates.shape
    H = h0.shape[-1]
    assert G == 4 * H and T % t_chunk == 0
    if b_shard is None:
        b_shard = Bp
    assert Bp % b_shard == 0
    num_b = Bp // b_shard
    num_c = T // t_chunk

    return pl.pallas_call(
        _lstm_chunk_kernel,
        out_shape=jax.ShapeDtypeStruct((T, Bp, H), jnp.float32),
        grid_spec=pltpu.PrefetchScalarGridSpec(
            num_scalar_prefetch=0,
            grid=(num_b, num_c),
            in_specs=[
                pl.BlockSpec((t_chunk, b_shard, G), lambda b, c: (c, b, 0)),  # X_gates chunk
                pl.BlockSpec((H, G), lambda b, c: (0, 0)),                    # W_hh^T
                pl.BlockSpec((b_shard, H), lambda b, c: (b, 0)),              # h0
                pl.BlockSpec((b_shard, H), lambda b, c: (b, 0)),              # c0
            ],
            out_specs=pl.BlockSpec((t_chunk, b_shard, H), lambda b, c: (c, b, 0)),
            scratch_shapes=[
                pltpu.VMEM((b_shard, H), jnp.float32),   # h state across chunks
                pltpu.VMEM((b_shard, H), jnp.float32),   # c state across chunks
            ],
        ),
        compiler_params=pltpu.CompilerParams(
            # batch shards are independent (v7x megacore); time is the serial
            # recurrence -> "arbitrary".
            dimension_semantics=("parallel", "arbitrary"),
        ),
    )(x_gates, w_hh_t, h0, c0)


def encoder_rnn_simple_forward(params, n_ids, t_ids, *, t_chunk=8,
                               bf16_input_projection=False):
    """Full forward: embeddings (JAX glue) + LSTM recurrence (Pallas).

    Returns (B, T, H), batch-first like the PyTorch module.
    """
    # --- glue: embedding gathers + concat (data-dependent gather stays in JAX) ---
    n_emb = jnp.take(params["embN"], n_ids, axis=0)              # (B, T, embN)
    t_emb = jnp.take(params["embT"], t_ids, axis=0)              # (B, T, embT)
    x = jnp.concatenate([n_emb, t_emb], axis=2).astype(jnp.float32)  # (B, T, E)
    B, T, E = x.shape
    H = params["hid_init"].shape[0]

    # Pad batch to the f32 sublane multiple (8) so the recurrent matmul / gate
    # math use full vregs (padded rows are sliced off at the end).
    Bp = max(8, ((B + 7) // 8) * 8)
    if Bp != B:
        x = jnp.pad(x, ((0, Bp - B), (0, 0), (0, 0)))

    # --- hoisted input projection: ONE big matmul for all time steps ---
    w_ih_t = params["w_ih"].T                                    # (E, 4H)
    bias = (params["b_ih"] + params["b_hh"]).astype(jnp.float32)
    if bf16_input_projection:
        # v6e/v7x option: bf16 MXU path with f32 accumulation for the only
        # compute-heavy matmul; gate math in the kernel stays f32.
        xg = jnp.einsum("bte,eg->tbg", x.astype(jnp.bfloat16),
                        w_ih_t.astype(jnp.bfloat16),
                        preferred_element_type=jnp.float32)
    else:
        xg = jnp.einsum("bte,eg->tbg", x, w_ih_t,
                        preferred_element_type=jnp.float32)
    xg = xg + bias[None, None, :]                                # (T, Bp, 4H)

    # Pad time to a chunk multiple (padded steps follow the real sequence, so
    # real outputs are unaffected; they are sliced off below).
    t_chunk = max(1, min(t_chunk, T))
    Tp = ((T + t_chunk - 1) // t_chunk) * t_chunk
    if Tp != T:
        xg = jnp.pad(xg, ((0, Tp - T), (0, 0), (0, 0)))

    h0 = jnp.broadcast_to(params["hid_init"][None, :], (Bp, H)).astype(jnp.float32)
    c0 = jnp.broadcast_to(params["cell_init"][None, :], (Bp, H)).astype(jnp.float32)

    out_tbh = lstm_pallas(xg, params["w_hh"].T.astype(jnp.float32), h0, c0,
                          t_chunk=t_chunk)                       # (Tp, Bp, H)
    # Single output-side transpose back to PyTorch's batch-first layout (the
    # input-side transpose was fused into the einsum above).
    return jnp.transpose(out_tbh[:T, :B, :], (1, 0, 2))          # (B, T, H)


def lstm_reference(x, w_ih, w_hh, bias, h0, c0):
    """Pure-JAX reference (lax.scan) for correctness check.  x: (B, T, E)."""
    H = h0.shape[-1]

    def step(carry, x_t):
        h, c = carry
        gates = x_t @ w_ih.T + h @ w_hh.T + bias
        i = jax.nn.sigmoid(gates[:, 0 * H:1 * H])
        f = jax.nn.sigmoid(gates[:, 1 * H:2 * H])
        g = jnp.tanh(gates[:, 2 * H:3 * H])
        o = jax.nn.sigmoid(gates[:, 3 * H:4 * H])
        c_new = f * c + i * g
        h_new = o * jnp.tanh(c_new)
        return (h_new, c_new), h_new

    _, hs = jax.lax.scan(step, (h0, c0), jnp.transpose(x, (1, 0, 2)))
    return jnp.transpose(hs, (1, 0, 2))


if __name__ == "__main__":
    # Small shapes consistent with the module.
    B, T = 2, 8
    hidden_size = 32
    vocab_sizeN, vocab_sizeT = 40, 50
    embedding_sizeN, embedding_sizeT = 16, 16
    E = embedding_sizeN + embedding_sizeT

    key = jax.random.PRNGKey(0)
    keys = jax.random.split(key, 10)

    params = {
        "embN": jax.random.normal(keys[0], (vocab_sizeN, embedding_sizeN), jnp.float32) * 0.1,
        "embT": jax.random.normal(keys[1], (vocab_sizeT, embedding_sizeT), jnp.float32) * 0.1,
        "w_ih": jax.random.normal(keys[2], (4 * hidden_size, E), jnp.float32) * 0.1,
        "w_hh": jax.random.normal(keys[3], (4 * hidden_size, hidden_size), jnp.float32) * 0.1,
        "b_ih": jax.random.normal(keys[4], (4 * hidden_size,), jnp.float32) * 0.1,
        "b_hh": jax.random.normal(keys[5], (4 * hidden_size,), jnp.float32) * 0.1,
        # module __init__ sets these to zeros; use small randoms to exercise the h0/c0 path
        "hid_init": jax.random.normal(keys[6], (hidden_size,), jnp.float32) * 0.1,
        "cell_init": jax.random.normal(keys[7], (hidden_size,), jnp.float32) * 0.1,
    }

    n_ids = jax.random.randint(keys[8], (B, T), 0, vocab_sizeN)
    t_ids = jax.random.randint(keys[9], (B, T), 0, vocab_sizeT)

    out = encoder_rnn_simple_forward(params, n_ids, t_ids, t_chunk=8)
    out = jax.block_until_ready(out)
    assert out.shape == (B, T, hidden_size)

    # Cross-check against pure-JAX reference.
    n_emb = jnp.take(params["embN"], n_ids, axis=0)
    t_emb = jnp.take(params["embT"], t_ids, axis=0)
    x = jnp.concatenate([n_emb, t_emb], axis=2)
    h0 = jnp.broadcast_to(params["hid_init"][None, :], (B, hidden_size))
    c0 = jnp.broadcast_to(params["cell_init"][None, :], (B, hidden_size))
    ref = lstm_reference(x, params["w_ih"], params["w_hh"],
                         params["b_ih"] + params["b_hh"], h0, c0)
    assert jnp.allclose(out, ref, atol=1e-4, rtol=1e-4), "mismatch vs reference"

    print("KERNEL_OK")
</pallas_src>

<mosaic_0001>
module attributes {stable_mosaic.version = 11 : i64} {
  func.func @_lstm_chunk_kernel(%arg0: i32, %arg1: i32, %arg2: memref<8x8x128xf32, #tpu.memory_space<vmem>>, %arg3: memref<32x128xf32, #tpu.memory_space<vmem>>, %arg4: memref<8x32xf32, #tpu.memory_space<vmem>>, %arg5: memref<8x32xf32, #tpu.memory_space<vmem>>, %arg6: memref<8x8x32xf32, #tpu.memory_space<vmem>>, %arg7: memref<8x32xf32, #tpu.memory_space<vmem>>, %arg8: memref<8x32xf32, #tpu.memory_space<vmem>>) attributes {dimension_semantics = [#tpu.dimension_semantics<parallel>, #tpu.dimension_semantics<arbitrary>], iteration_bounds = array<i64: 1, 1>, scalar_prefetch = 0 : i64, scratch_operands = 2 : i64, tpu.core_type = #tpu.core_type<tc>, window_params = [{transform_indices = @transform_0, window_bounds = array<i64: 8, 8, 128>}, {pipeline_mode = #tpu.pipeline_mode<synchronous>, transform_indices = @transform_1, window_bounds = array<i64: 32, 128>}, {transform_indices = @transform_2, window_bounds = array<i64: 8, 32>}, {transform_indices = @transform_3, window_bounds = array<i64: 8, 32>}, {transform_indices = @transform_4, window_bounds = array<i64: 8, 8, 32>}]} {
    %c0_i32 = arith.constant 0 : i32
    %0 = arith.cmpi eq, %arg1, %c0_i32 : i32
    %1 = arith.extui %0 : i1 to i32
    %c0_i32_0 = arith.constant 0 : i32
    %2 = arith.cmpi ne, %1, %c0_i32_0 : i32
    scf.if %2 {
      %c0_58 = arith.constant 0 : index
      %c0_59 = arith.constant 0 : index
      %200 = vector.load %arg4[%c0_58, %c0_59] : memref<8x32xf32, #tpu.memory_space<vmem>>, vector<8x32xf32>
      %c0_60 = arith.constant 0 : index
      %c0_61 = arith.constant 0 : index
      %201 = vector.load %arg7[%c0_60, %c0_61] : memref<8x32xf32, #tpu.memory_space<vmem>>, vector<8x32xf32>
      tpu.vector_store %arg7[%c0_60, %c0_61], %200 {strides = array<i32>} : memref<8x32xf32, #tpu.memory_space<vmem>>, vector<8x32xf32>,
      %c0_62 = arith.constant 0 : index
      %c0_63 = arith.constant 0 : index
      %202 = vector.load %arg5[%c0_62, %c0_63] : memref<8x32xf32, #tpu.memory_space<vmem>>, vector<8x32xf32>
      %c0_64 = arith.constant 0 : index
      %c0_65 = arith.constant 0 : index
      %203 = vector.load %arg8[%c0_64, %c0_65] : memref<8x32xf32, #tpu.memory_space<vmem>>, vector<8x32xf32>
      tpu.vector_store %arg8[%c0_64, %c0_65], %202 {strides = array<i32>} : memref<8x32xf32, #tpu.memory_space<vmem>>, vector<8x32xf32>,
    } else {
    }
    %c0 = arith.constant 0 : index
    %c0_1 = arith.constant 0 : index
    %3 = vector.load %arg3[%c0, %c0_1] : memref<32x128xf32, #tpu.memory_space<vmem>>, vector<32x128xf32>
    %c0_2 = arith.constant 0 : index
    %c0_3 = arith.constant 0 : index
    %4 = vector.load %arg7[%c0_2, %c0_3] : memref<8x32xf32, #tpu.memory_space<vmem>>, vector<8x32xf32>
    %c0_4 = arith.constant 0 : index
    %c0_5 = arith.constant 0 : index
    %5 = vector.load %arg8[%c0_4, %c0_5] : memref<8x32xf32, #tpu.memory_space<vmem>>, vector<8x32xf32>
    %c0_i32_6 = arith.constant 0 : i32
    %6 = arith.index_cast %c0_i32_6 : i32 to index
    %c0_7 = arith.constant 0 : index
    %c0_8 = arith.constant 0 : index
    %7 = vector.load %arg2[%6, %c0_7, %c0_8] : memref<8x8x128xf32, #tpu.memory_space<vmem>>, vector<1x8x128xf32>
    %8 = vector.shape_cast %7 : vector<1x8x128xf32> to vector<8x128xf32>
    %cst = arith.constant dense<0.000000e+00> : vector<8x128xf32>
    %9 = tpu.matmul %4, %3, %cst {dimension_numbers = #tpu.dot_dimension_numbers<[1], [0], [0], [1], [0, 0, 1, 1], [], []>} : vector<8x32xf32>, vector<32x128xf32>, vector<8x128xf32> -> vector<8x128xf32>
    %10 = arith.addf %8, %9 : vector<8x128xf32>
    %11 = arith.negf %10 : vector<8x128xf32>
    %12 = math.exp %11 : vector<8x128xf32>
    %cst_9 = arith.constant 1.000000e+00 : f32
    %13 = vector.broadcast %cst_9 : f32 to vector<8x128xf32>
    %14 = arith.addf %13, %12 : vector<8x128xf32>
    %15 = arith.divf %13, %14 : vector<8x128xf32>
    %16 = math.tanh %10 : vector<8x128xf32>
    %17 = vector.extract_strided_slice %15 {offsets = [0, 0], sizes = [8, 32], strides = [1, 1]} : vector<8x128xf32> to vector<8x32xf32>
    %18 = vector.extract_strided_slice %15 {offsets = [0, 32], sizes = [8, 32], strides = [1, 1]} : vector<8x128xf32> to vector<8x32xf32>
    %19 = vector.extract_strided_slice %16 {offsets = [0, 64], sizes = [8, 32], strides = [1, 1]} : vector<8x128xf32> to vector<8x32xf32>
    %20 = vector.extract_strided_slice %15 {offsets = [0, 96], sizes = [8, 32], strides = [1, 1]} : vector<8x128xf32> to vector<8x32xf32>
    %21 = arith.mulf %18, %5 : vector<8x32xf32>
    %22 = arith.mulf %17, %19 : vector<8x32xf32>
    %23 = arith.addf %21, %22 : vector<8x32xf32>
    %24 = math.tanh %23 : vector<8x32xf32>
    %25 = arith.mulf %20, %24 : vector<8x32xf32>
    %26 = arith.index_cast %c0_i32_6 : i32 to index
    %c0_10 = arith.constant 0 : index
    %c0_11 = arith.constant 0 : index
    %27 = vector.load %arg6[%26, %c0_10, %c0_11] : memref<8x8x32xf32, #tpu.memory_space<vmem>>, vector<1x8x32xf32>
    %28 = vector.shape_cast %27 : vector<1x8x32xf32> to vector<8x32xf32>
    %29 = vector.shape_cast %25 : vector<8x32xf32> to vector<1x8x32xf32>
    tpu.vector_store %arg6[%26, %c0_10, %c0_11], %29 {strides = array<i32>} : memref<8x8x32xf32, #tpu.memory_space<vmem>>, vector<1x8x32xf32>,
    %c1_i32 = arith.constant 1 : i32
    %30 = arith.index_cast %c1_i32 : i32 to index
    %c0_12 = arith.constant 0 : index
    %c0_13 = arith.constant 0 : index
    %31 = vector.load %arg2[%30, %c0_12, %c0_13] : memref<8x8x128xf32, #tpu.memory_space<vmem>>, vector<1x8x128xf32>
    %32 = vector.shape_cast %31 : vector<1x8x128xf32> to vector<8x128xf32>
    %cst_14 = arith.constant dense<0.000000e+00> : vector<8x128xf32>
    %33 = tpu.matmul %25, %3, %cst_14 {dimension_numbers = #tpu.dot_dimension_numbers<[1], [0], [0], [1], [0, 0, 1, 1], [], []>} : vector<8x32xf32>, vector<32x128xf32>, vector<8x128xf32> -> vector<8x128xf32>
    %34 = arith.addf %32, %33 : vector<8x128xf32>
    %35 = arith.negf %34 : vector<8x128xf32>
    %36 = math.exp %35 : vector<8x128xf32>
    %cst_15 = arith.constant 1.000000e+00 : f32
    %37 = vector.broadcast %cst_15 : f32 to vector<8x128xf32>
    %38 = arith.addf %37, %36 : vector<8x128xf32>
    %39 = arith.divf %37, %38 : vector<8x128xf32>
    %40 = math.tanh %34 : vector<8x128xf32>
    %41 = vector.extract_strided_slice %39 {offsets = [0, 0], sizes = [8, 32], strides = [1, 1]} : vector<8x128xf32> to vector<8x32xf32>
    %42 = vector.extract_strided_slice %39 {offsets = [0, 32], sizes = [8, 32], strides = [1, 1]} : vector<8x128xf32> to vector<8x32xf32>
    %43 = vector.extract_strided_slice %40 {offsets = [0, 64], sizes = [8, 32], strides = [1, 1]} : vector<8x128xf32> to vector<8x32xf32>
    %44 = vector.extract_strided_slice %39 {offsets = [0, 96], sizes = [8, 32], strides = [1, 1]} : vector<8x128xf32> to vector<8x32xf32>
    %45 = arith.mulf %42, %23 : vector<8x32xf32>
    %46 = arith.mulf %41, %43 : vector<8x32xf32>
    %47 = arith.addf %45, %46 : vector<8x32xf32>
    %48 = math.tanh %47 : vector<8x32xf32>
    %49 = arith.mulf %44, %48 : vector<8x32xf32>
    %50 = arith.index_cast %c1_i32 : i32 to index
    %c0_16 = arith.constant 0 : index
    %c0_17 = arith.constant 0 : index
    %51 = vector.load %arg6[%50, %c0_16, %c0_17] : memref<8x8x32xf32, #tpu.memory_space<vmem>>, vector<1x8x32xf32>
    %52 = vector.shape_cast %51 : vector<1x8x32xf32> to vector<8x32xf32>
    %53 = vector.shape_cast %49 : vector<8x32xf32> to vector<1x8x32xf32>
    tpu.vector_store %arg6[%50, %c0_16, %c0_17], %53 {strides = array<i32>} : memref<8x8x32xf32, #tpu.memory_space<vmem>>, vector<1x8x32xf32>,
    %c2_i32 = arith.constant 2 : i32
    %54 = arith.index_cast %c2_i32 : i32 to index
    %c0_18 = arith.constant 0 : index
    %c0_19 = arith.constant 0 : index
    %55 = vector.load %arg2[%54, %c0_18, %c0_19] : memref<8x8x128xf32, #tpu.memory_space<vmem>>, vector<1x8x128xf32>
    %56 = vector.shape_cast %55 : vector<1x8x128xf32> to vector<8x128xf32>
    %cst_20 = arith.constant dense<0.000000e+00> : vector<8x128xf32>
    %57 = tpu.matmul %49, %3, %cst_20 {dimension_numbers = #tpu.dot_dimension_numbers<[1], [0], [0], [1], [0, 0, 1, 1], [], []>} : vector<8x32xf32>, vector<32x128xf32>, vector<8x128xf32> -> vector<8x128xf32>
    %58 = arith.addf %56, %57 : vector<8x128xf32>
    %59 = arith.negf %58 : vector<8x128xf32>
    %60 = math.exp %59 : vector<8x128xf32>
    %cst_21 = arith.constant 1.000000e+00 : f32
    %61 = vector.broadcast %cst_21 : f32 to vector<8x128xf32>
    %62 = arith.addf %61, %60 : vector<8x128xf32>
    %63 = arith.divf %61, %62 : vector<8x128xf32>
    %64 = math.tanh %58 : vector<8x128xf32>
    %65 = vector.extract_strided_slice %63 {offsets = [0, 0], sizes = [8, 32], strides = [1, 1]} : vector<8x128xf32> to vector<8x32xf32>
    %66 = vector.extract_strided_slice %63 {offsets = [0, 32], sizes = [8, 32], strides = [1, 1]} : vector<8x128xf32> to vector<8x32xf32>
    %67 = vector.extract_strided_slice %64 {offsets = [0, 64], sizes = [8, 32], strides = [1, 1]} : vector<8x128xf32> to vector<8x32xf32>
    %68 = vector.extract_strided_slice %63 {offsets = [0, 96], sizes = [8, 32], strides = [1, 1]} : vector<8x128xf32> to vector<8x32xf32>
    %69 = arith.mulf %66, %47 : vector<8x32xf32>
    %70 = arith.mulf %65, %67 : vector<8x32xf32>
    %71 = arith.addf %69, %70 : vector<8x32xf32>
    %72 = math.tanh %71 : vector<8x32xf32>
    %73 = arith.mulf %68, %72 : vector<8x32xf32>
    %74 = arith.index_cast %c2_i32 : i32 to index
    %c0_22 = arith.constant 0 : index
    %c0_23 = arith.constant 0 : index
    %75 = vector.load %arg6[%74, %c0_22, %c0_23] : memref<8x8x32xf32, #tpu.memory_space<vmem>>, vector<1x8x32xf32>
    %76 = vector.shape_cast %75 : vector<1x8x32xf32> to vector<8x32xf32>
    %77 = vector.shape_cast %73 : vector<8x32xf32> to vector<1x8x32xf32>
    tpu.vector_store %arg6[%74, %c0_22, %c0_23], %77 {strides = array<i32>} : memref<8x8x32xf32, #tpu.memory_space<vmem>>, vector<1x8x32xf32>,
    %c3_i32 = arith.constant 3 : i32
    %78 = arith.index_cast %c3_i32 : i32 to index
    %c0_24 = arith.constant 0 : index
    %c0_25 = arith.constant 0 : index
    %79 = vector.load %arg2[%78, %c0_24, %c0_25] : memref<8x8x128xf32, #tpu.memory_space<vmem>>, vector<1x8x128xf32>
    %80 = vector.shape_cast %79 : vector<1x8x128xf32> to vector<8x128xf32>
    %cst_26 = arith.constant dense<0.000000e+00> : vector<8x128xf32>
    %81 = tpu.matmul %73, %3, %cst_26 {dimension_numbers = #tpu.dot_dimension_numbers<[1], [0], [0], [1], [0, 0, 1, 1], [], []>} : vector<8x32xf32>, vector<32x128xf32>, vector<8x128xf32> -> vector<8x128xf32>
    %82 = arith.addf %80, %81 : vector<8x128xf32>
    %83 = arith.negf %82 : vector<8x128xf32>
    %84 = math.exp %83 : vector<8x128xf32>
    %cst_27 = arith.constant 1.000000e+00 : f32
    %85 = vector.broadcast %cst_27 : f32 to vector<8x128xf32>
    %86 = arith.addf %85, %84 : vector<8x128xf32>
    %87 = arith.divf %85, %86 : vector<8x128xf32>
    %88 = math.tanh %82 : vector<8x128xf32>
    %89 = vector.extract_strided_slice %87 {offsets = [0, 0], sizes = [8, 32], strides = [1, 1]} : vector<8x128xf32> to vector<8x32xf32>
    %90 = vector.extract_strided_slice %87 {offsets = [0, 32], sizes = [8, 32], strides = [1, 1]} : vector<8x128xf32> to vector<8x32xf32>
    %91 = vector.extract_strided_slice %88 {offsets = [0, 64], sizes = [8, 32], strides = [1, 1]} : vector<8x128xf32> to vector<8x32xf32>
    %92 = vector.extract_strided_slice %87 {offsets = [0, 96], sizes = [8, 32], strides = [1, 1]} : vector<8x128xf32> to vector<8x32xf32>
    %93 = arith.mulf %90, %71 : vector<8x32xf32>
    %94 = arith.mulf %89, %91 : vector<8x32xf32>
    %95 = arith.addf %93, %94 : vector<8x32xf32>
    %96 = math.tanh %95 : vector<8x32xf32>
    %97 = arith.mulf %92, %96 : vector<8x32xf32>
    %98 = arith.index_cast %c3_i32 : i32 to index
    %c0_28 = arith.constant 0 : index
    %c0_29 = arith.constant 0 : index
    %99 = vector.load %arg6[%98, %c0_28, %c0_29] : memref<8x8x32xf32, #tpu.memory_space<vmem>>, vector<1x8x32xf32>
    %100 = vector.shape_cast %99 : vector<1x8x32xf32> to vector<8x32xf32>
    %101 = vector.shape_cast %97 : vector<8x32xf32> to vector<1x8x32xf32>
    tpu.vector_store %arg6[%98, %c0_28, %c0_29], %101 {strides = array<i32>} : memref<8x8x32xf32, #tpu.memory_space<vmem>>, vector<1x8x32xf32>,
    %c4_i32 = arith.constant 4 : i32
    %102 = arith.index_cast %c4_i32 : i32 to index
    %c0_30 = arith.constant 0 : index
    %c0_31 = arith.constant 0 : index
    %103 = vector.load %arg2[%102, %c0_30, %c0_31] : memref<8x8x128xf32, #tpu.memory_space<vmem>>, vector<1x8x128xf32>
    %104 = vector.shape_cast %103 : vector<1x8x128xf32> to vector<8x128xf32>
    %cst_32 = arith.constant dense<0.000000e+00> : vector<8x128xf32>
    %105 = tpu.matmul %97, %3, %cst_32 {dimension_numbers = #tpu.dot_dimension_numbers<[1], [0], [0], [1], [0, 0, 1, 1], [], []>} : vector<8x32xf32>, vector<32x128xf32>, vector<8x128xf32> -> vector<8x128xf32>
    %106 = arith.addf %104, %105 : vector<8x128xf32>
    %107 = arith.negf %106 : vector<8x128xf32>
    %108 = math.exp %107 : vector<8x128xf32>
    %cst_33 = arith.constant 1.000000e+00 : f32
    %109 = vector.broadcast %cst_33 : f32 to vector<8x128xf32>
    %110 = arith.addf %109, %108 : vector<8x128xf32>
    %111 = arith.divf %109, %110 : vector<8x128xf32>
    %112 = math.tanh %106 : vector<8x128xf32>
    %113 = vector.extract_strided_slice %111 {offsets = [0, 0], sizes = [8, 32], strides = [1, 1]} : vector<8x128xf32> to vector<8x32xf32>
    %114 = vector.extract_strided_slice %111 {offsets = [0, 32], sizes = [8, 32], strides = [1, 1]} : vector<8x128xf32> to vector<8x32xf32>
    %115 = vector.extract_strided_slice %112 {offsets = [0, 64], sizes = [8, 32], strides = [1, 1]} : vector<8x128xf32> to vector<8x32xf32>
    %116 = vector.extract_strided_slice %111 {offsets = [0, 96], sizes = [8, 32], strides = [1, 1]} : vector<8x128xf32> to vector<8x32xf32>
    %117 = arith.mulf %114, %95 : vector<8x32xf32>
    %118 = arith.mulf %113, %115 : vector<8x32xf32>
    %119 = arith.addf %117, %118 : vector<8x32xf32>
    %120 = math.tanh %119 : vector<8x32xf32>
    %121 = arith.mulf %116, %120 : vector<8x32xf32>
    %122 = arith.index_cast %c4_i32 : i32 to index
    %c0_34 = arith.constant 0 : index
    %c0_35 = arith.constant 0 : index
    %123 = vector.load %arg6[%122, %c0_34, %c0_35] : memref<8x8x32xf32, #tpu.memory_space<vmem>>, vector<1x8x32xf32>
    %124 = vector.shape_cast %123 : vector<1x8x32xf32> to vector<8x32xf32>
    %125 = vector.shape_cast %121 : vector<8x32xf32> to vector<1x8x32xf32>
    tpu.vector_store %arg6[%122, %c0_34, %c0_35], %125 {strides = array<i32>} : memref<8x8x32xf32, #tpu.memory_space<vmem>>, vector<1x8x32xf32>,
    %c5_i32 = arith.constant 5 : i32
    %126 = arith.index_cast %c5_i32 : i32 to index
    %c0_36 = arith.constant 0 : index
    %c0_37 = arith.constant 0 : index
    %127 = vector.load %arg2[%126, %c0_36, %c0_37] : memref<8x8x128xf32, #tpu.memory_space<vmem>>, vector<1x8x128xf32>
    %128 = vector.shape_cast %127 : vector<1x8x128xf32> to vector<8x128xf32>
    %cst_38 = arith.constant dense<0.000000e+00> : vector<8x128xf32>
    %129 = tpu.matmul %121, %3, %cst_38 {dimension_numbers = #tpu.dot_dimension_numbers<[1], [0], [0], [1], [0, 0, 1, 1], [], []>} : vector<8x32xf32>, vector<32x128xf32>, vector<8x128xf32> -> vector<8x128xf32>
    %130 = arith.addf %128, %129 : vector<8x128xf32>
    %131 = arith.negf %130 : vector<8x128xf32>
    %132 = math.exp %131 : vector<8x128xf32>
    %cst_39 = arith.constant 1.000000e+00 : f32
    %133 = vector.broadcast %cst_39 : f32 to vector<8x128xf32>
    %134 = arith.addf %133, %132 : vector<8x128xf32>
    %135 = arith.divf %133, %134 : vector<8x128xf32>
    %136 = math.tanh %130 : vector<8x128xf32>
    %137 = vector.extract_strided_slice %135 {offsets = [0, 0], sizes = [8, 32], strides = [1, 1]} : vector<8x128xf32> to vector<8x32xf32>
    %138 = vector.extract_strided_slice %135 {offsets = [0, 32], sizes = [8, 32], strides = [1, 1]} : vector<8x128xf32> to vector<8x32xf32>
    %139 = vector.extract_strided_slice %136 {offsets = [0, 64], sizes = [8, 32], strides = [1, 1]} : vector<8x128xf32> to vector<8x32xf32>
    %140 = vector.extract_strided_slice %135 {offsets = [0, 96], sizes = [8, 32], strides = [1, 1]} : vector<8x128xf32> to vector<8x32xf32>
    %141 = arith.mulf %138, %119 : vector<8x32xf32>
    %142 = arith.mulf %137, %139 : vector<8x32xf32>
    %143 = arith.addf %141, %142 : vector<8x32xf32>
    %144 = math.tanh %143 : vector<8x32xf32>
    %145 = arith.mulf %140, %144 : vector<8x32xf32>
    %146 = arith.index_cast %c5_i32 : i32 to index
    %c0_40 = arith.constant 0 : index
    %c0_41 = arith.constant 0 : index
    %147 = vector.load %arg6[%146, %c0_40, %c0_41] : memref<8x8x32xf32, #tpu.memory_space<vmem>>, vector<1x8x32xf32>
    %148 = vector.shape_cast %147 : vector<1x8x32xf32> to vector<8x32xf32>
    %149 = vector.shape_cast %145 : vector<8x32xf32> to vector<1x8x32xf32>
    tpu.vector_store %arg6[%146, %c0_40, %c0_41], %149 {strides = array<i32>} : memref<8x8x32xf32, #tpu.memory_space<vmem>>, vector<1x8x32xf32>,
    %c6_i32 = arith.constant 6 : i32
    %150 = arith.index_cast %c6_i32 : i32 to index
    %c0_42 = arith.constant 0 : index
    %c0_43 = arith.constant 0 : index
    %151 = vector.load %arg2[%150, %c0_42, %c0_43] : memref<8x8x128xf32, #tpu.memory_space<vmem>>, vector<1x8x128xf32>
    %152 = vector.shape_cast %151 : vector<1x8x128xf32> to vector<8x128xf32>
    %cst_44 = arith.constant dense<0.000000e+00> : vector<8x128xf32>
    %153 = tpu.matmul %145, %3, %cst_44 {dimension_numbers = #tpu.dot_dimension_numbers<[1], [0], [0], [1], [0, 0, 1, 1], [], []>} : vector<8x32xf32>, vector<32x128xf32>, vector<8x128xf32> -> vector<8x128xf32>
    %154 = arith.addf %152, %153 : vector<8x128xf32>
    %155 = arith.negf %154 : vector<8x128xf32>
    %156 = math.exp %155 : vector<8x128xf32>
    %cst_45 = arith.constant 1.000000e+00 : f32
    %157 = vector.broadcast %cst_45 : f32 to vector<8x128xf32>
    %158 = arith.addf %157, %156 : vector<8x128xf32>
    %159 = arith.divf %157, %158 : vector<8x128xf32>
    %160 = math.tanh %154 : vector<8x128xf32>
    %161 = vector.extract_strided_slice %159 {offsets = [0, 0], sizes = [8, 32], strides = [1, 1]} : vector<8x128xf32> to vector<8x32xf32>
    %162 = vector.extract_strided_slice %159 {offsets = [0, 32], sizes = [8, 32], strides = [1, 1]} : vector<8x128xf32> to vector<8x32xf32>
    %163 = vector.extract_strided_slice %160 {offsets = [0, 64], sizes = [8, 32], strides = [1, 1]} : vector<8x128xf32> to vector<8x32xf32>
    %164 = vector.extract_strided_slice %159 {offsets = [0, 96], sizes = [8, 32], strides = [1, 1]} : vector<8x128xf32> to vector<8x32xf32>
    %165 = arith.mulf %162, %143 : vector<8x32xf32>
    %166 = arith.mulf %161, %163 : vector<8x32xf32>
    %167 = arith.addf %165, %166 : vector<8x32xf32>
    %168 = math.tanh %167 : vector<8x32xf32>
    %169 = arith.mulf %164, %168 : vector<8x32xf32>
    %170 = arith.index_cast %c6_i32 : i32 to index
    %c0_46 = arith.constant 0 : index
    %c0_47 = arith.constant 0 : index
    %171 = vector.load %arg6[%170, %c0_46, %c0_47] : memref<8x8x32xf32, #tpu.memory_space<vmem>>, vector<1x8x32xf32>
    %172 = vector.shape_cast %171 : vector<1x8x32xf32> to vector<8x32xf32>
    %173 = vector.shape_cast %169 : vector<8x32xf32> to vector<1x8x32xf32>
    tpu.vector_store %arg6[%170, %c0_46, %c0_47], %173 {strides = array<i32>} : memref<8x8x32xf32, #tpu.memory_space<vmem>>, vector<1x8x32xf32>,
    %c7_i32 = arith.constant 7 : i32
    %174 = arith.index_cast %c7_i32 : i32 to index
    %c0_48 = arith.constant 0 : index
    %c0_49 = arith.constant 0 : index
    %175 = vector.load %arg2[%174, %c0_48, %c0_49] : memref<8x8x128xf32, #tpu.memory_space<vmem>>, vector<1x8x128xf32>
    %176 = vector.shape_cast %175 : vector<1x8x128xf32> to vector<8x128xf32>
    %cst_50 = arith.constant dense<0.000000e+00> : vector<8x128xf32>
    %177 = tpu.matmul %169, %3, %cst_50 {dimension_numbers = #tpu.dot_dimension_numbers<[1], [0], [0], [1], [0, 0, 1, 1], [], []>} : vector<8x32xf32>, vector<32x128xf32>, vector<8x128xf32> -> vector<8x128xf32>
    %178 = arith.addf %176, %177 : vector<8x128xf32>
    %179 = arith.negf %178 : vector<8x128xf32>
    %180 = math.exp %179 : vector<8x128xf32>
    %cst_51 = arith.constant 1.000000e+00 : f32
    %181 = vector.broadcast %cst_51 : f32 to vector<8x128xf32>
    %182 = arith.addf %181, %180 : vector<8x128xf32>
    %183 = arith.divf %181, %182 : vector<8x128xf32>
    %184 = math.tanh %178 : vector<8x128xf32>
    %185 = vector.extract_strided_slice %183 {offsets = [0, 0], sizes = [8, 32], strides = [1, 1]} : vector<8x128xf32> to vector<8x32xf32>
    %186 = vector.extract_strided_slice %183 {offsets = [0, 32], sizes = [8, 32], strides = [1, 1]} : vector<8x128xf32> to vector<8x32xf32>
    %187 = vector.extract_strided_slice %184 {offsets = [0, 64], sizes = [8, 32], strides = [1, 1]} : vector<8x128xf32> to vector<8x32xf32>
    %188 = vector.extract_strided_slice %183 {offsets = [0, 96], sizes = [8, 32], strides = [1, 1]} : vector<8x128xf32> to vector<8x32xf32>
    %189 = arith.mulf %186, %167 : vector<8x32xf32>
    %190 = arith.mulf %185, %187 : vector<8x32xf32>
    %191 = arith.addf %189, %190 : vector<8x32xf32>
    %192 = math.tanh %191 : vector<8x32xf32>
    %193 = arith.mulf %188, %192 : vector<8x32xf32>
    %194 = arith.index_cast %c7_i32 : i32 to index
    %c0_52 = arith.constant 0 : index
    %c0_53 = arith.constant 0 : index
    %195 = vector.load %arg6[%194, %c0_52, %c0_53] : memref<8x8x32xf32, #tpu.memory_space<vmem>>, vector<1x8x32xf32>
    %196 = vector.shape_cast %195 : vector<1x8x32xf32> to vector<8x32xf32>
    %197 = vector.shape_cast %193 : vector<8x32xf32> to vector<1x8x32xf32>
    tpu.vector_store %arg6[%194, %c0_52, %c0_53], %197 {strides = array<i32>} : memref<8x8x32xf32, #tpu.memory_space<vmem>>, vector<1x8x32xf32>,
    %c8_i32 = arith.constant 8 : i32
    %c0_54 = arith.constant 0 : index
    %c0_55 = arith.constant 0 : index
    %198 = vector.load %arg7[%c0_54, %c0_55] : memref<8x32xf32, #tpu.memory_space<vmem>>, vector<8x32xf32>
    tpu.vector_store %arg7[%c0_54, %c0_55], %193 {strides = array<i32>} : memref<8x32xf32, #tpu.memory_space<vmem>>, vector<8x32xf32>,
    %c0_56 = arith.constant 0 : index
    %c0_57 = arith.constant 0 : index
    %199 = vector.load %arg8[%c0_56, %c0_57] : memref<8x32xf32, #tpu.memory_space<vmem>>, vector<8x32xf32>
    tpu.vector_store %arg8[%c0_56, %c0_57], %191 {strides = array<i32>} : memref<8x32xf32, #tpu.memory_space<vmem>>, vector<8x32xf32>,
    return
  }
  func.func @transform_0(%arg0: i32, %arg1: i32) -> (i32, i32, i32) {
    %c0_i32 = arith.constant 0 : i32
    %c0_i32_0 = arith.constant 0 : i32
    return %arg1, %arg0, %c0_i32 : i32, i32, i32
  }
  func.func @transform_1(%arg0: i32, %arg1: i32) -> (i32, i32) {
    %c0_i32 = arith.constant 0 : i32
    %c0_i32_0 = arith.constant 0 : i32
    %c0_i32_1 = arith.constant 0 : i32
    return %c0_i32, %c0_i32_0 : i32, i32
  }
  func.func @transform_2(%arg0: i32, %arg1: i32) -> (i32, i32) {
    %c0_i32 = arith.constant 0 : i32
    %c0_i32_0 = arith.constant 0 : i32
    return %arg0, %c0_i32 : i32, i32
  }
  func.func @transform_3(%arg0: i32, %arg1: i32) -> (i32, i32) {
    %c0_i32 = arith.constant 0 : i32
    %c0_i32_0 = arith.constant 0 : i32
    return %arg0, %c0_i32 : i32, i32
  }
  func.func @transform_4(%arg0: i32, %arg1: i32) -> (i32, i32, i32) {
    %c0_i32 = arith.constant 0 : i32
    %c0_i32_0 = arith.constant 0 : i32
    return %arg1, %arg0, %c0_i32 : i32, i32, i32
  }
}

</mosaic_0001>

<bundles_post_ra>
// kernel: tpu_custom_call.1
= control target key start
LH: loop header
LB: loop body
LE: loop exit
PB: predicated region body
PF: predicated region fallthrough
CT: control target
= control target key end

     0   :  { %9 = vsyncpa [#allocation5], 0  ;;  %s1511_s0 = inlined_call_operand.hbm [shape: f32[8,8,128], index: 0, kind: input, shape index: {}]   ;;  %s1512_s1 = inlined_call_operand.hbm [shape: f32[32,128], index: 1, kind: input, shape index: {}]   ;;  %s1513_s2 = inlined_call_operand.hbm [shape: f32[8,32], index: 2, kind: input, shape index: {}]   ;;  %s1514_s3 = inlined_call_operand.vmem [shape: f32[8,32], index: 3, kind: input, shape index: {}]   ;;  %s1515_s4 = inlined_call_operand.hbm [shape: f32[8,8,32], index: 4, kind: output, shape index: {}]  }
   0x1   :  { %10 = vsyncpa [#allocation8], 0 }
   0x2   :  { %11 = vsyncpa [#allocation6], 0  ;;  %s1302_s15 = smov [#allocation7]   ;;  %s1303_s17 = smov [#allocation4]  }
   0x3   :  { %s29_s16 = sshll.u32 %s1302_s15, 4  ;;  %s17_s18 = sshll.u32 %s1303_s17, 4  ;;  %s30_s16 = int_to_ptr.vmem [resolvable:$true] %s29_s16  ;;  %s1339_s18 = int_to_ptr.vmem [resolvable:$true] %s17_s18 }
   0x4   :  { %s1208_s21 = scalar_lea.hbm %s1512_s1, 512 }
   0x5   :  { %p1209_p0 = scmp.ne.s32.totalorder %s1512_s1, %s1208_s21  ;;  %p1212_p1 = scmp.lt.u32.totalorder %s1208_s21, %s1512_s1 }
   0x7   :  { %p1214_p2 = pnand %p1212_p1, %p1209_p0 }
   0x9   :  { %1217 = shalt.err (!%p1214_p2)
}
   0xa   :  { %s1218_s26 = scalar_lea.vmem %s30_s16, 512  ;;  %p1223_p4 = scmp.lt.s32.totalorder %s30_s16, %s30_s16 }
   0xb   :  { %p1219_p3 = scmp.ne.s32.totalorder %s30_s16, %s1218_s26  ;;  %p1224_p5 = scmp.lt.s32.totalorder %s1218_s26, %s1218_s26 }
   0xd   :  { %p1225_p6 = por %p1224_p5, %p1223_p4 }
   0xf   :  { %p1226_p7 = pnand %p1225_p6, %p1219_p3 }
  0x11   :  { %1229 = shalt.err (!%p1226_p7)
}
  0x12   :  { %s1304_s27 = smov 128   ;;  %s1305_s28 = smov 8  }
  0x13   :  { %35 = dma.hbm_to_vmem [thread:$0]  %s1512_s1, 512, %s30_s16, [#allocation8], %s1304_s27, %s1304_s27, %s1305_s28  }
  0x14   :  { %s1230_s7 = scalar_lea.hbm %s1511_s0, 1024 }
  0x15   :  { %p1231_p8 = scmp.ne.s32.totalorder %s1511_s0, %s1230_s7  ;;  %p1234_p9 = scmp.lt.u32.totalorder %s1230_s7, %s1511_s0 }
  0x17   :  { %p1236_p10 = pnand %p1234_p9, %p1231_p8 }
  0x19   :  { %1239 = shalt.err (!%p1236_p10)
}
  0x1a   :  { %s1240_s12 = scalar_lea.vmem %s1339_s18, 1024  ;;  %p1245_p12 = scmp.lt.s32.totalorder %s1339_s18, %s1339_s18 }
  0x1b   :  { %p1241_p11 = scmp.ne.s32.totalorder %s1339_s18, %s1240_s12  ;;  %p1246_p13 = scmp.lt.s32.totalorder %s1240_s12, %s1240_s12 }
  0x1d   :  { %p1247_p0 = por %p1246_p13, %p1245_p12 }
  0x1f   :  { %p1248_p1 = pnand %p1247_p0, %p1241_p11 }
  0x21   :  { %1251 = shalt.err (!%p1248_p1)
}
  0x22   :  { %23 = dma.hbm_to_vmem [thread:$0]  %s1511_s0, 1024, %s1339_s18, [#allocation5], %s1304_s27, %s1304_s27, %s1305_s28  }
  0x23   :  { %s1306_s14 = smov [#allocation9]   ;;  %s1252_s19 = scalar_lea.hbm %s1513_s2, 128 }
  0x24   :  { %s42_s15 = sshll.u32 %s1306_s14, 4  ;;  %p1253_p2 = scmp.ne.s32.totalorder %s1513_s2, %s1252_s19  ;;  %s43_s15 = int_to_ptr.vmem [resolvable:$true] %s42_s15 }
  0x25   :  { %p1256_p3 = scmp.lt.u32.totalorder %s1252_s19, %s1513_s2 }
  0x27   :  { %p1258_p4 = pnand %p1256_p3, %p1253_p2 }
  0x29   :  { %1261 = shalt.err (!%p1258_p4)
}
  0x2a   :  { %s1262_s24 = scalar_lea.vmem %s43_s15, 128  ;;  %p1267_p6 = scmp.lt.s32.totalorder %s43_s15, %s43_s15 }
  0x2b   :  { %p1263_p5 = scmp.ne.s32.totalorder %s43_s15, %s1262_s24  ;;  %p1268_p7 = scmp.lt.s32.totalorder %s1262_s24, %s1262_s24 }
  0x2d   :  { %p1269_p8 = por %p1268_p7, %p1267_p6 }
  0x2f   :  { %p1270_p9 = pnand %p1269_p8, %p1263_p5 }
  0x31   :  { %1273 = shalt.err (!%p1270_p9)
}
  0x32   :  { %45 = dma.hbm_to_vmem [thread:$0]  %s1513_s2, 128, %s43_s15, [#allocation8]  }
  0x33   :  { %1296 = dma.done.wait [#allocation5], 1024  }
  0x34   :  { %1297 = vsyncadd [#allocation5], 4294966272 }
  0x35   :  { %1298 = dma.done.wait [#allocation8], 640  }
  0x36   :  { %1299 = vsyncadd [#allocation8], 4294966656  ;;  %v1307_v0 = vmov 0.0|0.0   ;;  %vm1308_vm0 = vmmov 0   ;;  %v1309_v1 = vmov 0.0   ;;  %vm62_vm1 = vcmask 261120  }
  0x37   :  { %1084 = vmatprep.subr.bf16.mxu0 %v1307_v0  ;;  %1004 = vmatprep.mubr.msk.f32.mxu0 %vm1308_vm0, %v1309_v1  ;;  %v66_v2 = vld [vmem:[#allocation7] sm:$0xff]  ;;  %v67_v3 = vld [vmem:[#allocation7 + $0x8] sm:$0xff]  ;;  %v68_v4 = vld [vmem:[#allocation7 + $0x10] sm:$0xff]  ;;  %s1310_s26 = smov 64   ;;  %s1311_s29 = smov 32  }
  0x38   :  { %1090 = vmatprep.subr.bf16.mxu1 %v1307_v0  ;;  %1015 = vmatprep.mubr.msk.f32.mxu1 %vm1308_vm0, %v1309_v1  ;;  %v1394_v5 = vpack.c.bf16 %v67_v3, %v66_v2  ;;  %v69_v6 = vld [vmem:[#allocation7 + $0x18] sm:$0xff]  ;;  %v61_v7 = vld [vmem:[#allocation9] sm:$0xff]  ;;  %v64_v10 = vld [vmem:[%s1514_s3] sm:$0xff]  ;;  %s1312_s3 = smov 96   ;;  %s1313_s30 = smov [#allocation10]  }
  0x39   :  { %63 = vst.msk [vmem:[#allocation2] sm:$0xff] %vm62_vm1, %v61_v7  ;;  %v1398_v8 = vpack.c.bf16 %v69_v6, %v68_v4  ;;  %65 = vst.msk [vmem:[#allocation3] sm:$0xff] %vm62_vm1, %v64_v10  ;;  %v72_v11 = vld [vmem:[#allocation4] sm:$0xff]  ;;  %v182_v31 = vld [vmem:[#allocation4 + $0x8] sm:$0xff]  ;;  %s927_s5 = sshll.u32 %s1313_s30, 4  ;;  %s928_s5 = int_to_ptr.vmem [resolvable:$true] %s927_s5 }
  0x3a   :  { %1086 = vmatpush3.bf16.msra.mxu0 %v1394_v5  ;;  %1092 = vmatpush3.bf16.msra.mxu1 %v1394_v5  ;;  %v287_v49 = vld [vmem:[#allocation4 + $0x10] sm:$0xff]  ;;  %v392_v6 = vld [vmem:[#allocation4 + $0x18] sm:$0xff]  ;;  %s1274_s6 = scalar_lea.vmem %s928_s5, 1024  ;;  %p1279_p11 = scmp.lt.s32.totalorder %s928_s5, %s928_s5 }
  0x3b   :  { %1087 = vmatprep.subr.bf16.mxu0 %v1307_v0  ;;  %1093 = vmatprep.subr.bf16.mxu1 %v1307_v0  ;;  %p1275_p10 = scmp.ne.s32.totalorder %s928_s5, %s1274_s6  ;;  %p1280_p12 = scmp.lt.s32.totalorder %s1274_s6, %s1274_s6 }
  0x3d   :  { %p1281_p13 = por %p1280_p12, %p1279_p11 }
  0x3e   :  { %1089 = vmatpush3.bf16.msra.mxu0 %v1398_v8  ;;  %1095 = vmatpush3.bf16.msra.mxu1 %v1398_v8 }
  0x3f   :  { %1096 = vmatprep.subr.bf16.mxu0 %v1307_v0  ;;  %1102 = vmatprep.subr.bf16.mxu1 %v1307_v0  ;;  %p1282_p0 = pnand %p1281_p13, %p1275_p10 }
  0x40   :  { %v70_v9 = vld [vmem:[#allocation2] sm:$0xff]  ;;  %v71_v16 = vld [vmem:[#allocation3] sm:$0xff] }
  0x41   :  { %1005 = vmatmul.mubr.msk.f32.vlgmr.msra.gmra.mrb[0].mxu0 %vm62_vm1, %v70_v9 }
  0x42   :  { %1098 = vmatpush3.bf16.msra.mxu0 %v1394_v5  ;;  %1026 = vmatprep.mubr.msk.f32.mxu0 %vm1308_vm0, %v1309_v1 }
  0x43   :  { %1099 = vmatprep.subr.bf16.mxu0 %v1307_v0 }
  0x46   :  { %1101 = vmatpush3.bf16.msra.mxu0 %v1398_v8 }
  0x47   :  { %1108 = vmatprep.subr.bf16.mxu0 %v1307_v0 }
 0x114   :  { %v143_v12 = vpop.f32.mrb[0].mxu0 }
 0x115   :  { %v147_v13 = vadd.f32 %v143_v12, %v72_v11  ;;  %v1006_v14 = vpop.f32.mrb[1].mxu0 }
 0x117   :  { %1144 = vtanh.f32 %v147_v13  ;;  %v941_v17 = vmul.f32 -1.442695, %v147_v13 }
 0x119   :  { %1146 = vpow2.f32 %v941_v17 }
 0x121   :  { %v1145_v15 = vpop.eup %1144 }
 0x122   :  { %161 = vrot.lane.b32.xlu0 %v1145_v15, %s1310_s26 }
 0x123   :  { %v1147_v18 = vpop.eup %1146 }
 0x124   :  { %v151_v19 = vadd.f32 1.0, %v1147_v18 }
 0x126   :  { %156 = vrot.lane.b32.xlu0 %v71_v16, %s1311_s29  ;;  %1148 = vrcp.f32 %v151_v19 }
 0x130   :  { %v1149_v20 = vpop.eup %1148 }
 0x194   :  { %v162_v21 = vpop.permute.xlu0 %161 }
 0x195   :  { %v164_v22 = vmul.f32 %v1149_v20, %v162_v21 }
 0x197   :  { %166 = vrot.lane.b32.xlu1 %v164_v22, %s1311_s29 }
 0x198   :  { %v157_v23 = vpop.permute.xlu0 %156 }
 0x199   :  { %v159_v24 = vmul.f32 %v1149_v20, %v157_v23 }
 0x209   :  { %v167_v25 = vpop.permute.xlu1 %166 }
 0x20a   :  { %v169_v26 = vadd.f32 %v167_v25, %v159_v24  ;;  %v497_v25 = vld [vmem:[#allocation4 + $0x20] sm:$0xff] }
 0x20c   :  { %1150 = vtanh.f32 %v169_v26 }
 0x216   :  { %v1151_v27 = vpop.eup %1150 }
 0x217   :  { %172 = vrot.lane.b32.xlu1 %v1151_v27, %s1310_s26 }
 0x289   :  { %v173_v28 = vpop.permute.xlu1 %172 }
 0x28a   :  { %v175_v29 = vmul.f32 %v1149_v20, %v173_v28 }
 0x28c   :  { %177 = vrot.lane.b32.xlu0 %v175_v29, %s1311_s29 }
 0x2fe   :  { %v178_v30 = vpop.permute.xlu0 %177 }
 0x2ff   :  { %180 = vst.msk [vmem:[#allocation10] sm:$0xff] %vm62_vm1, %v178_v30  ;;  %1016 = vmatmul.mubr.msk.f32.vlgmr.msra.gmra.mrb[0].mxu1 %vm62_vm1, %v178_v30 }
 0x300   :  { %1104 = vmatpush3.bf16.msra.mxu1 %v1394_v5  ;;  %1037 = vmatprep.mubr.msk.f32.mxu1 %vm1308_vm0, %v1309_v1 }
 0x301   :  { %1105 = vmatprep.subr.bf16.mxu1 %v1307_v0 }
 0x304   :  { %1107 = vmatpush3.bf16.msra.mxu1 %v1398_v8 }
 0x305   :  { %1114 = vmatprep.subr.bf16.mxu1 %v1307_v0 }
 0x3d2   :  { %v251_v32 = vpop.f32.mrb[0].mxu1 }
 0x3d3   :  { %v255_v33 = vadd.f32 %v251_v32, %v182_v31  ;;  %v1017_v34 = vpop.f32.mrb[1].mxu1 }
 0x3d5   :  { %1152 = vtanh.f32 %v255_v33  ;;  %v943_v36 = vmul.f32 -1.442695, %v255_v33 }
 0x3d7   :  { %1154 = vpow2.f32 %v943_v36 }
 0x3df   :  { %v1153_v35 = vpop.eup %1152 }
 0x3e0   :  { %265 = vrot.lane.b32.xlu1 %v1153_v35, %s1310_s26 }
 0x3e1   :  { %v1155_v37 = vpop.eup %1154 }
 0x3e2   :  { %v259_v38 = vadd.f32 1.0, %v1155_v37 }
 0x3e4   :  { %1156 = vrcp.f32 %v259_v38 }
 0x3ee   :  { %v1157_v39 = vpop.eup %1156 }
 0x3ef   :  { %v263_v42 = vmul.f32 %v1157_v39, %v169_v26 }
 0x452   :  { %v266_v40 = vpop.permute.xlu1 %265 }
 0x453   :  { %v268_v41 = vmul.f32 %v1157_v39, %v266_v40 }
 0x455   :  { %270 = vrot.lane.b32.xlu0 %v268_v41, %s1311_s29 }
 0x4c7   :  { %v271_v43 = vpop.permute.xlu0 %270 }
 0x4c8   :  { %v273_v44 = vadd.f32 %v271_v43, %v263_v42  ;;  %v602_v43 = vld [vmem:[#allocation4 + $0x28] sm:$0xff] }
 0x4ca   :  { %1158 = vtanh.f32 %v273_v44 }
 0x4d4   :  { %v1159_v45 = vpop.eup %1158 }
 0x4d5   :  { %276 = vrot.lane.b32.xlu1 %v1159_v45, %s1310_s26 }
 0x547   :  { %v277_v46 = vpop.permute.xlu1 %276 }
 0x548   :  { %v279_v47 = vmul.f32 %v1157_v39, %v277_v46 }
 0x54a   :  { %281 = vrot.lane.b32.xlu0 %v279_v47, %s1311_s29 }
 0x5bc   :  { %v282_v48 = vpop.permute.xlu0 %281 }
 0x5bd   :  { %285 = vst.msk [vmem:[#allocation10 + $0x8] sm:$0xff] %vm62_vm1, %v282_v48  ;;  %1027 = vmatmul.mubr.msk.f32.vlgmr.msra.gmra.mrb[2].mxu0 %vm62_vm1, %v282_v48 }
 0x5be   :  { %1110 = vmatpush3.bf16.msra.mxu0 %v1394_v5  ;;  %1048 = vmatprep.mubr.msk.f32.mxu0 %vm1308_vm0, %v1309_v1 }
 0x5bf   :  { %1111 = vmatprep.subr.bf16.mxu0 %v1307_v0 }
 0x5c2   :  { %1113 = vmatpush3.bf16.msra.mxu0 %v1398_v8 }
 0x5c3   :  { %1120 = vmatprep.subr.bf16.mxu0 %v1307_v0 }
 0x690   :  { %v356_v50 = vpop.f32.mrb[2].mxu0 }
 0x691   :  { %v360_v51 = vadd.f32 %v356_v50, %v287_v49  ;;  %v1028_v52 = vpop.f32.mrb[3].mxu0 }
 0x693   :  { %1160 = vtanh.f32 %v360_v51  ;;  %v945_v54 = vmul.f32 -1.442695, %v360_v51 }
 0x695   :  { %1162 = vpow2.f32 %v945_v54 }
 0x69d   :  { %v1161_v53 = vpop.eup %1160 }
 0x69e   :  { %370 = vrot.lane.b32.xlu1 %v1161_v53, %s1310_s26 }
 0x69f   :  { %v1163_v55 = vpop.eup %1162 }
 0x6a0   :  { %v364_v56 = vadd.f32 1.0, %v1163_v55 }
 0x6a2   :  { %1164 = vrcp.f32 %v364_v56 }
 0x6ac   :  { %v1165_v57 = vpop.eup %1164 }
 0x6ad   :  { %v368_v60 = vmul.f32 %v1165_v57, %v273_v44 }
 0x710   :  { %v371_v58 = vpop.permute.xlu1 %370 }
 0x711   :  { %v373_v59 = vmul.f32 %v1165_v57, %v371_v58 }
 0x713   :  { %375 = vrot.lane.b32.xlu0 %v373_v59, %s1311_s29 }
 0x785   :  { %v376_v61 = vpop.permute.xlu0 %375 }
 0x786   :  { %v378_v62 = vadd.f32 %v376_v61, %v368_v60 }
 0x788   :  { %1166 = vtanh.f32 %v378_v62 }
 0x792   :  { %v1167_v63 = vpop.eup %1166 }
 0x793   :  { %381 = vrot.lane.b32.xlu1 %v1167_v63, %s1310_s26 }
 0x805   :  { %v382_v2 = vpop.permute.xlu1 %381 }
 0x806   :  { %v384_v3 = vmul.f32 %v1165_v57, %v382_v2  ;;  %v707_v57 = vld [vmem:[#allocation4 + $0x30] sm:$0xff] }
 0x808   :  { %386 = vrot.lane.b32.xlu0 %v384_v3, %s1311_s29 }
 0x87a   :  { %v387_v4 = vpop.permute.xlu0 %386 }
 0x87b   :  { %390 = vst.msk [vmem:[#allocation10 + $0x10] sm:$0xff] %vm62_vm1, %v387_v4  ;;  %1038 = vmatmul.mubr.msk.f32.vlgmr.msra.gmra.mrb[2].mxu1 %vm62_vm1, %v387_v4 }
 0x87c   :  { %1116 = vmatpush3.bf16.msra.mxu1 %v1394_v5  ;;  %1059 = vmatprep.mubr.msk.f32.mxu1 %vm1308_vm0, %v1309_v1 }
 0x87d   :  { %1117 = vmatprep.subr.bf16.mxu1 %v1307_v0 }
 0x880   :  { %1119 = vmatpush3.bf16.msra.mxu1 %v1398_v8 }
 0x881   :  { %1126 = vmatprep.subr.bf16.mxu1 %v1307_v0 }
 0x94e   :  { %v461_v7 = vpop.f32.mrb[2].mxu1 }
 0x94f   :  { %v465_v9 = vadd.f32 %v461_v7, %v392_v6  ;;  %v1039_v10 = vpop.f32.mrb[3].mxu1 }
 0x951   :  { %1168 = vtanh.f32 %v465_v9  ;;  %v947_v12 = vmul.f32 -1.442695, %v465_v9 }
 0x953   :  { %1170 = vpow2.f32 %v947_v12 }
 0x95b   :  { %v1169_v11 = vpop.eup %1168 }
 0x95c   :  { %475 = vrot.lane.b32.xlu1 %v1169_v11, %s1310_s26 }
 0x95d   :  { %v1171_v13 = vpop.eup %1170 }
 0x95e   :  { %v469_v14 = vadd.f32 1.0, %v1171_v13 }
 0x960   :  { %1172 = vrcp.f32 %v469_v14 }
 0x96a   :  { %v1173_v15 = vpop.eup %1172 }
 0x96b   :  { %v473_v18 = vmul.f32 %v1173_v15, %v378_v62 }
 0x9ce   :  { %v476_v16 = vpop.permute.xlu1 %475 }
 0x9cf   :  { %v478_v17 = vmul.f32 %v1173_v15, %v476_v16 }
 0x9d1   :  { %480 = vrot.lane.b32.xlu0 %v478_v17, %s1311_s29 }
 0xa43   :  { %v481_v19 = vpop.permute.xlu0 %480 }
 0xa44   :  { %v483_v20 = vadd.f32 %v481_v19, %v473_v18 }
 0xa46   :  { %1174 = vtanh.f32 %v483_v20 }
 0xa50   :  { %v1175_v21 = vpop.eup %1174 }
 0xa51   :  { %486 = vrot.lane.b32.xlu1 %v1175_v21, %s1310_s26 }
 0xac3   :  { %v487_v22 = vpop.permute.xlu1 %486 }
 0xac4   :  { %v489_v23 = vmul.f32 %v1173_v15, %v487_v22  ;;  %v812_v15 = vld [vmem:[#allocation4 + $0x38] sm:$0xff] }
 0xac6   :  { %491 = vrot.lane.b32.xlu0 %v489_v23, %s1311_s29 }
 0xb38   :  { %v492_v24 = vpop.permute.xlu0 %491 }
 0xb39   :  { %495 = vst.msk [vmem:[#allocation10 + $0x18] sm:$0xff] %vm62_vm1, %v492_v24  ;;  %1049 = vmatmul.mubr.msk.f32.vlgmr.msra.gmra.mrb[4].mxu0 %vm62_vm1, %v492_v24 }
 0xb3a   :  { %1122 = vmatpush3.bf16.msra.mxu0 %v1394_v5  ;;  %1070 = vmatprep.mubr.msk.f32.mxu0 %vm1308_vm0, %v1309_v1 }
 0xb3b   :  { %1123 = vmatprep.subr.bf16.mxu0 %v1307_v0 }
 0xb3e   :  { %1125 = vmatpush3.bf16.msra.mxu0 %v1398_v8 }
 0xc0c   :  { %v566_v26 = vpop.f32.mrb[4].mxu0 }
 0xc0d   :  { %v570_v27 = vadd.f32 %v566_v26, %v497_v25  ;;  %v1050_v28 = vpop.f32.mrb[5].mxu0 }
 0xc0f   :  { %1176 = vtanh.f32 %v570_v27  ;;  %v949_v30 = vmul.f32 -1.442695, %v570_v27 }
 0xc11   :  { %1178 = vpow2.f32 %v949_v30 }
 0xc19   :  { %v1177_v29 = vpop.eup %1176 }
 0xc1a   :  { %580 = vrot.lane.b32.xlu1 %v1177_v29, %s1310_s26 }
 0xc1b   :  { %v1179_v31 = vpop.eup %1178 }
 0xc1c   :  { %v574_v32 = vadd.f32 1.0, %v1179_v31 }
 0xc1e   :  { %1180 = vrcp.f32 %v574_v32 }
 0xc28   :  { %v1181_v33 = vpop.eup %1180 }
 0xc29   :  { %v578_v36 = vmul.f32 %v1181_v33, %v483_v20 }
 0xc8c   :  { %v581_v34 = vpop.permute.xlu1 %580 }
 0xc8d   :  { %v583_v35 = vmul.f32 %v1181_v33, %v581_v34 }
 0xc8f   :  { %585 = vrot.lane.b32.xlu0 %v583_v35, %s1311_s29 }
 0xd01   :  { %v586_v37 = vpop.permute.xlu0 %585 }
 0xd02   :  { %v588_v38 = vadd.f32 %v586_v37, %v578_v36 }
 0xd04   :  { %1182 = vtanh.f32 %v588_v38 }
 0xd0e   :  { %v1183_v39 = vpop.eup %1182 }
 0xd0f   :  { %591 = vrot.lane.b32.xlu1 %v1183_v39, %s1310_s26 }
 0xd81   :  { %v592_v40 = vpop.permute.xlu1 %591 }
 0xd82   :  { %v594_v41 = vmul.f32 %v1181_v33, %v592_v40 }
 0xd84   :  { %596 = vrot.lane.b32.xlu0 %v594_v41, %s1311_s29 }
 0xdf6   :  { %v597_v42 = vpop.permute.xlu0 %596 }
 0xdf7   :  { %600 = vst.msk [vmem:[#allocation10 + $0x20] sm:$0xff] %vm62_vm1, %v597_v42  ;;  %1060 = vmatmul.mubr.msk.f32.vlgmr.msra.gmra.mrb[4].mxu1 %vm62_vm1, %v597_v42 }
 0xdf8   :  { %1128 = vmatpush3.bf16.msra.mxu1 %v1394_v5  ;;  %1081 = vmatprep.mubr.msk.f32.mxu1 %vm1308_vm0, %v1309_v1 }
 0xdf9   :  { %1129 = vmatprep.subr.bf16.mxu1 %v1307_v0 }
 0xdfc   :  { %1131 = vmatpush3.bf16.msra.mxu1 %v1398_v8 }
 0xeca   :  { %v671_v44 = vpop.f32.mrb[4].mxu1 }
 0xecb   :  { %v675_v45 = vadd.f32 %v671_v44, %v602_v43  ;;  %v1061_v46 = vpop.f32.mrb[5].mxu1 }
 0xecd   :  { %1184 = vtanh.f32 %v675_v45  ;;  %v951_v48 = vmul.f32 -1.442695, %v675_v45 }
 0xecf   :  { %1186 = vpow2.f32 %v951_v48 }
 0xed7   :  { %v1185_v47 = vpop.eup %1184 }
 0xed8   :  { %685 = vrot.lane.b32.xlu1 %v1185_v47, %s1310_s26 }
 0xed9   :  { %v1187_v49 = vpop.eup %1186 }
 0xeda   :  { %v679_v50 = vadd.f32 1.0, %v1187_v49 }
 0xedc   :  { %1188 = vrcp.f32 %v679_v50 }
 0xee6   :  { %v1189_v5 = vpop.eup %1188 }
 0xee7   :  { %v683_v0 = vmul.f32 %v1189_v5, %v588_v38 }
 0xf4a   :  { %v686_v51 = vpop.permute.xlu1 %685 }
 0xf4b   :  { %v688_v1 = vmul.f32 %v1189_v5, %v686_v51 }
 0xf4d   :  { %690 = vrot.lane.b32.xlu0 %v688_v1, %s1311_s29 }
 0xfbf   :  { %v691_v8 = vpop.permute.xlu0 %690 }
 0xfc0   :  { %v693_v52 = vadd.f32 %v691_v8, %v683_v0 }
 0xfc2   :  { %1190 = vtanh.f32 %v693_v52 }
 0xfcc   :  { %v1191_v53 = vpop.eup %1190 }
 0xfcd   :  { %696 = vrot.lane.b32.xlu1 %v1191_v53, %s1310_s26 }
0x103f   :  { %v697_v54 = vpop.permute.xlu1 %696 }
0x1040   :  { %v699_v55 = vmul.f32 %v1189_v5, %v697_v54 }
0x1042   :  { %701 = vrot.lane.b32.xlu0 %v699_v55, %s1311_s29 }
0x10b4   :  { %v702_v56 = vpop.permute.xlu0 %701 }
0x10b5   :  { %705 = vst.msk [vmem:[#allocation10 + $0x28] sm:$0xff] %vm62_vm1, %v702_v56  ;;  %1071 = vmatmul.mubr.msk.f32.vlgmr.msra.gmra.mrb[6].mxu0 %vm62_vm1, %v702_v56 }
0x1188   :  { %v776_v58 = vpop.f32.mrb[6].mxu0 }
0x1189   :  { %v780_v59 = vadd.f32 %v776_v58, %v707_v57  ;;  %v1072_v60 = vpop.f32.mrb[7].mxu0 }
0x118b   :  { %1192 = vtanh.f32 %v780_v59  ;;  %v953_v62 = vmul.f32 -1.442695, %v780_v59 }
0x118d   :  { %1194 = vpow2.f32 %v953_v62 }
0x1195   :  { %v1193_v61 = vpop.eup %1192 }
0x1196   :  { %790 = vrot.lane.b32.xlu1 %v1193_v61, %s1310_s26 }
0x1197   :  { %v1195_v63 = vpop.eup %1194 }
0x1198   :  { %v784_v2 = vadd.f32 1.0, %v1195_v63 }
0x119a   :  { %1196 = vrcp.f32 %v784_v2 }
0x11a4   :  { %v1197_v3 = vpop.eup %1196 }
0x11a5   :  { %v788_v7 = vmul.f32 %v1197_v3, %v693_v52 }
0x1208   :  { %v791_v4 = vpop.permute.xlu1 %790 }
0x1209   :  { %v793_v6 = vmul.f32 %v1197_v3, %v791_v4 }
0x120b   :  { %795 = vrot.lane.b32.xlu0 %v793_v6, %s1311_s29 }
0x127d   :  { %v796_v9 = vpop.permute.xlu0 %795 }
0x127e   :  { %v798_v10 = vadd.f32 %v796_v9, %v788_v7 }
0x1280   :  { %1198 = vtanh.f32 %v798_v10 }
0x128a   :  { %v1199_v11 = vpop.eup %1198 }
0x128b   :  { %801 = vrot.lane.b32.xlu1 %v1199_v11, %s1310_s26 }
0x12fd   :  { %v802_v12 = vpop.permute.xlu1 %801 }
0x12fe   :  { %v804_v13 = vmul.f32 %v1197_v3, %v802_v12 }
0x1300   :  { %806 = vrot.lane.b32.xlu0 %v804_v13, %s1311_s29 }
0x1372   :  { %v807_v14 = vpop.permute.xlu0 %806 }
0x1373   :  { %810 = vst.msk [vmem:[#allocation10 + $0x30] sm:$0xff] %vm62_vm1, %v807_v14  ;;  %1082 = vmatmul.mubr.msk.f32.vlgmr.msra.gmra.mrb[6].mxu1 %vm62_vm1, %v807_v14 }
0x1446   :  { %v881_v16 = vpop.f32.mrb[6].mxu1 }
0x1447   :  { %v885_v17 = vadd.f32 %v881_v16, %v812_v15  ;;  %v1083_v18 = vpop.f32.mrb[7].mxu1 }
0x1449   :  { %1200 = vtanh.f32 %v885_v17  ;;  %v955_v20 = vmul.f32 -1.442695, %v885_v17 }
0x144b   :  { %1202 = vpow2.f32 %v955_v20 }
0x1453   :  { %v1201_v19 = vpop.eup %1200 }
0x1454   :  { %895 = vrot.lane.b32.xlu1 %v1201_v19, %s1310_s26 }
0x1455   :  { %v1203_v21 = vpop.eup %1202 }
0x1456   :  { %v889_v22 = vadd.f32 1.0, %v1203_v21 }
0x1458   :  { %1204 = vrcp.f32 %v889_v22 }
0x1462   :  { %v1205_v23 = vpop.eup %1204 }
0x1463   :  { %v893_v26 = vmul.f32 %v1205_v23, %v798_v10 }
0x14c6   :  { %v896_v24 = vpop.permute.xlu1 %895 }
0x14c7   :  { %v898_v25 = vmul.f32 %v1205_v23, %v896_v24 }
0x14c9   :  { %900 = vrot.lane.b32.xlu0 %v898_v25, %s1311_s29 }
0x153b   :  { %v901_v27 = vpop.permute.xlu0 %900 }
0x153c   :  { %v903_v28 = vadd.f32 %v901_v27, %v893_v26 }
0x153e   :  { %1206 = vtanh.f32 %v903_v28 }
0x1548   :  { %v1207_v29 = vpop.eup %1206 }
0x1549   :  { %906 = vrot.lane.b32.xlu1 %v1207_v29, %s1310_s26 }
0x154d   :  { %918 = vrot.lane.b32.xlu1 %v903_v28, %s1312_s3 }
0x15bb   :  { %v907_v30 = vpop.permute.xlu1 %906 }
0x15bc   :  { %v909_v31 = vmul.f32 %v1205_v23, %v907_v30 }
0x15be   :  { %911 = vrot.lane.b32.xlu0 %v909_v31, %s1311_s29 }
0x15bf   :  { %v919_v32 = vpop.permute.xlu1 %918 }
0x15c0   :  { %921 = vst.msk [vmem:[#allocation3] sm:$0xff] %vm62_vm1, %v919_v32 }
0x1630   :  { %v912_v33 = vpop.permute.xlu0 %911 }
0x1631   :  { %915 = vst.msk [vmem:[#allocation10 + $0x38] sm:$0xff] %vm62_vm1, %v912_v33  ;;  %916 = vst.msk [vmem:[#allocation2] sm:$0xff] %vm62_vm1, %v912_v33 }
0x1632   :  { %1285 = shalt.err (!%p1282_p0)
}
0x1633   :  { %s1286_s9 = scalar_lea.hbm %s1515_s4, 1024 }
0x1634   :  { %p1287_p1 = scmp.ne.s32.totalorder %s1515_s4, %s1286_s9  ;;  %p1290_p2 = scmp.lt.u32.totalorder %s1286_s9, %s1515_s4 }
0x1636   :  { %p1292_p3 = pnand %p1290_p2, %p1287_p1 }
0x1638   :  { %1295 = shalt.err (!%p1292_p3)
}
0x1639   :  { %933 = dma.vmem_to_hbm [thread:$0]  %s928_s5, 1024, %s1515_s4, [#allocation6], %s1304_s27, %s1304_s27, %s1305_s28  }
0x163a   :  { %1300 = dma.done.wait [#allocation6], 1024  }
0x163b   :  { %1301 = vsyncadd [#allocation6], 4294966272 }
0x163c   :  { %937 = vsyncpa [#allocation5], 1 }
0x163d   :  { %938 = vsyncpa [#allocation8], 1 }
0x163e   :  { %939 = vsyncpa [#allocation6], 1 }

</bundles_post_ra>
